<compile_context>
chip_gen: v5e
topology: v5e:2x2
jax: 0.10.0
libtpu: 0.0.40
codegen_flags: <defaults>
</compile_context>

<pallas_src>
import jax
import jax.numpy as jnp
from jax.experimental import pallas as pl
from jax.experimental.pallas import tpu as pltpu


# ----------------------------- kernels -------------------------------------


def _bilinear_kernel_split(xa_ref, xb_ref, w_ref, o_ref):
    # xa_ref, xb_ref: [TB, D]   (delivered by two lane-aligned DMAs)
    # w_ref:          [D, D]    (resident, single-buffered)
    # o_ref:          [1, 1, TB] lane-dense scores
    xw = jnp.dot(xa_ref[...], w_ref[...], preferred_element_type=jnp.float32)
    s = jnp.sum(xw * xb_ref[...], axis=-1)                    # [TB], f32
    o_ref[...] = s.reshape(1, 1, -1).astype(o_ref.dtype)


def _bilinear_kernel_fused(emb_ref, w_ref, o_ref):
    # emb_ref: [TB, 2*D], each row = [emb_a_row | emb_b_row]
    d = w_ref.shape[0]
    xa = emb_ref[:, pl.ds(0, d)]                               # Ref slice (no full-tile load)
    xb = emb_ref[:, pl.ds(d, d)]
    xw = jnp.dot(xa, w_ref[...], preferred_element_type=jnp.float32)
    s = jnp.sum(xw * xb, axis=-1)                              # [TB], f32
    o_ref[...] = s.reshape(1, 1, -1).astype(o_ref.dtype)


# ----------------------------- helpers --------------------------------------


def _round_up(x, m):
    return ((x + m - 1) // m) * m


def _cdiv(a, b):
    return (a + b - 1) // b


def _vmem_capacity_bytes():
    try:
        return int(pltpu.get_tpu_info().vmem_capacity_bytes)
    except Exception:
        return 128 << 20  # assume a 128 MiB-VMEM part if the query is unavailable


def _const_weight_spec(d):
    """Constant-index weight spec; single-buffered when pipeline_mode is supported."""
    idx = lambda i: (0, 0)
    try:
        return pl.BlockSpec((d, d), idx, pipeline_mode=pl.Buffered(1)), 1
    except (TypeError, AttributeError):
        return pl.BlockSpec((d, d), idx), 2


def _reference(emb, weight):
    # Eval-mode dropout == identity.
    return jnp.sum(jnp.matmul(emb[:, 0, :], weight) * emb[:, 1, :], axis=-1)


# ----------------------------- wrapper ---------------------------------------


def bilinear_score(emb, weight, *, block_b=None, force_pallas=False):
    """emb: [B, 2, D], weight: [D, D] -> score: [B]."""
    B, two, D = emb.shape
    assert two == 2
    assert weight.shape == (D, D)
    out_dtype = jnp.promote_types(emb.dtype, weight.dtype)

    # Tiny problems: kernel-launch + pipeline prologue dominate; let XLA fuse.
    if B < 8 or (not force_pallas and (emb.nbytes + weight.nbytes) < (1 << 20)):
        return _reference(emb, weight).astype(out_dtype)

    emb_item = emb.dtype.itemsize
    w_item = weight.dtype.itemsize
    out_item = jnp.dtype(out_dtype).itemsize
    d_pad = _round_up(D, 128)

    # Per-generation VMEM budget: 75% of physical (~48 MiB v7x, ~96 MiB v5e/v6e),
    # leaving headroom for compiler-internal scratch / semaphores.
    usable = (_vmem_capacity_bytes() * 3) // 4
    headroom = 2 << 20

    w_spec, n_w_bufs = _const_weight_spec(D)
    weight_vmem = n_w_bufs * _round_up(D, 8) * d_pad * w_item

    avail_act = usable - weight_vmem - headroom
    min_step_bytes = 2 * (8 * 2 * d_pad * emb_item)  # two buffers of an 8-row tile
    if avail_act < min_step_bytes:
        # Resident weight no longer fits alongside double-buffered activations.
        # TODO(synk): contraction-tiled path (grid over D chunks, accumulator in
        #             scratch, pl.when init/finalize); graceful XLA fallback here.
        return _reference(emb, weight).astype(out_dtype)

    # Per-grid-step activation bytes: large enough to amortize ~0.35us/step DMA
    # overhead, small enough to double-buffer within the budget.
    per_step_cap = min(avail_act // 2, 16 << 20)
    tb_cap = (per_step_cap // (2 * d_pad * emb_item)) // 8 * 8

    # Keep >= ~4 grid steps when B allows it so the "parallel" batch axis can be
    # split across both v7x TensorCores.
    tb_split = _round_up(_cdiv(B, 4), 8)
    TB = max(8, min(tb_cap, tb_split, _round_up(B, 8)))
    if block_b is not None:
        TB = max(8, min(TB, _round_up(block_b, 8)))
    num_tiles = _cdiv(B, TB)

    # Layout-preserving reshape: row b = [emb[b, 0, :], emb[b, 1, :]].
    emb2 = emb.reshape(B, 2 * D)

    act_vmem = 2 * TB * 2 * d_pad * emb_item                    # double-buffered a+b tiles
    out_vmem = 2 * 8 * _round_up(TB, 128) * out_item            # double-buffered score rows
    vmem_limit = int(max(min(act_vmem + weight_vmem + out_vmem + headroom, usable),
                         16 << 20))

    cost = pl.CostEstimate(
        flops=2 * B * D * D,
        transcendentals=0,
        bytes_accessed=emb.nbytes + weight.nbytes + B * out_item,
    )
    cparams = pltpu.CompilerParams(
        dimension_semantics=("parallel",),
        vmem_limit_bytes=vmem_limit,
    )

    if D % 128 == 0:
        # Two lane-aligned DMAs deliver emb_a / emb_b into separate VMEM buffers.
        in_specs = [
            pl.BlockSpec((TB, D), lambda i: (i, 0)),            # emb_a half
            pl.BlockSpec((TB, D), lambda i: (i, 1)),            # emb_b half
            w_spec,
        ]
        kernel = _bilinear_kernel_split
        operands = (emb2, emb2, weight)
    else:
        in_specs = [
            pl.BlockSpec((TB, 2 * D), lambda i: (i, 0)),        # combined tile
            w_spec,
        ]
        kernel = _bilinear_kernel_fused
        operands = (emb2, weight)

    out = pl.pallas_call(
        kernel,
        out_shape=jax.ShapeDtypeStruct((num_tiles, 1, TB), out_dtype),
        grid_spec=pltpu.PrefetchScalarGridSpec(
            num_scalar_prefetch=0,
            grid=(num_tiles,),
            in_specs=in_specs,
            out_specs=pl.BlockSpec((1, 1, TB), lambda i: (i, 0, 0)),
        ),
        compiler_params=cparams,
        cost_estimate=cost,
    )(*operands)

    # Lane-dense (num_tiles, 1, TB) -> flatten, trim tail-tile padding.
    return out.reshape(num_tiles * TB)[:B]


# ----------------------------- test ------------------------------------------


if __name__ == "__main__":
    key = jax.random.PRNGKey(0)
    k_w, k1, k2, k3 = jax.random.split(key, 4)

    # Module-nominal shape (batch=8, emb_dim=32).
    B, D = 8, 32
    stdv = 1.0 / jnp.sqrt(jnp.float32(D))
    weight = jax.random.uniform(k_w, (D, D), jnp.float32, minval=-stdv, maxval=stdv)
    emb = jax.random.normal(k1, (B, 2, D), dtype=jnp.float32)
    ref1 = _reference(emb, weight)

    # 1) Pallas path at the nominal shape (single grid step, fused kernel).
    s1 = jax.block_until_ready(bilinear_score(emb, weight, force_pallas=True))
    assert s1.shape == (B,)
    assert jnp.allclose(s1, ref1, atol=1e-4, rtol=1e-4), (s1, ref1)

    # 2) Small-shape XLA fallback (guarded entry).
    s2 = jax.block_until_ready(bilinear_score(emb, weight))
    assert s2.shape == (B,)
    assert jnp.allclose(s2, ref1, atol=1e-4, rtol=1e-4), (s2, ref1)

    # 3) Multi-step pipelined grid + partial last tile (fused path, D % 128 != 0).
    B3 = 40
    emb3 = jax.random.normal(k2, (B3, 2, D), dtype=jnp.float32)
    s3 = jax.block_until_ready(bilinear_score(emb3, weight, force_pallas=True))
    ref3 = _reference(emb3, weight)
    assert s3.shape == (B3,)
    assert jnp.allclose(s3, ref3, atol=1e-4, rtol=1e-4), (s3, ref3)

    # 4) Lane-aligned split path (D % 128 == 0), multi-step grid.
    B4, D4 = 48, 128
    stdv4 = 1.0 / jnp.sqrt(jnp.float32(D4))
    w4 = jax.random.uniform(k_w, (D4, D4), jnp.float32, minval=-stdv4, maxval=stdv4)
    emb4 = jax.random.normal(k3, (B4, 2, D4), dtype=jnp.float32)
    s4 = jax.block_until_ready(bilinear_score(emb4, w4, force_pallas=True))
    ref4 = _reference(emb4, w4)
    assert s4.shape == (B4,)
    assert jnp.allclose(s4, ref4, atol=1e-4, rtol=1e-4), (s4, ref4)

    print("KERNEL_OK")
</pallas_src>

<mosaic_0001>
module attributes {stable_mosaic.version = 11 : i64} {
  func.func @_bilinear_kernel_fused(%arg0: i32, %arg1: memref<8x64xf32, #tpu.memory_space<vmem>>, %arg2: memref<32x32xf32, #tpu.memory_space<vmem>>, %arg3: memref<1x1x8xf32, #tpu.memory_space<vmem>>) attributes {dimension_semantics = [#tpu.dimension_semantics<parallel>], iteration_bounds = array<i64: 1>, scalar_prefetch = 0 : i64, scratch_operands = 0 : i64, tpu.core_type = #tpu.core_type<tc>, window_params = [{transform_indices = @transform_0, window_bounds = array<i64: 8, 64>}, {pipeline_mode = #tpu.pipeline_mode<synchronous>, transform_indices = @transform_1, window_bounds = array<i64: 32, 32>}, {transform_indices = @transform_2, window_bounds = array<i64: 1, 1, 8>}]} {
    %c0 = arith.constant 0 : index
    %c0_0 = arith.constant 0 : index
    %0 = vector.load %arg1[%c0, %c0_0] : memref<8x64xf32, #tpu.memory_space<vmem>>, vector<8x32xf32>
    %c0_1 = arith.constant 0 : index
    %c32 = arith.constant 32 : index
    %1 = vector.load %arg1[%c0_1, %c32] : memref<8x64xf32, #tpu.memory_space<vmem>>, vector<8x32xf32>
    %c0_2 = arith.constant 0 : index
    %c0_3 = arith.constant 0 : index
    %2 = vector.load %arg2[%c0_2, %c0_3] : memref<32x32xf32, #tpu.memory_space<vmem>>, vector<32x32xf32>
    %cst = arith.constant dense<0.000000e+00> : vector<8x32xf32>
    %3 = tpu.matmul %0, %2, %cst {dimension_numbers = #tpu.dot_dimension_numbers<[1], [0], [0], [1], [0, 0, 1, 1], [], []>} : vector<8x32xf32>, vector<32x32xf32>, vector<8x32xf32> -> vector<8x32xf32>
    %4 = arith.mulf %3, %1 : vector<8x32xf32>
    %cst_4 = arith.constant dense<0.000000e+00> : vector<8xf32>
    %5 = vector.multi_reduction <add>, %4, %cst_4 [1] : vector<8x32xf32> to vector<8xf32>
    %6 = vector.shape_cast %5 : vector<8xf32> to vector<1x1x8xf32>
    %c0_5 = arith.constant 0 : index
    %c0_6 = arith.constant 0 : index
    %c0_7 = arith.constant 0 : index
    %7 = vector.load %arg3[%c0_5, %c0_6, %c0_7] : memref<1x1x8xf32, #tpu.memory_space<vmem>>, vector<1x1x8xf32>
    tpu.vector_store %arg3[%c0_5, %c0_6, %c0_7], %6 {strides = array<i32>} : memref<1x1x8xf32, #tpu.memory_space<vmem>>, vector<1x1x8xf32>,
    return
  }
  func.func @transform_0(%arg0: i32) -> (i32, i32) {
    %c0_i32 = arith.constant 0 : i32
    %c0_i32_0 = arith.constant 0 : i32
    return %arg0, %c0_i32 : i32, i32
  }
  func.func @transform_1(%arg0: i32) -> (i32, i32) {
    %c0_i32 = arith.constant 0 : i32
    %c0_i32_0 = arith.constant 0 : i32
    %c0_i32_1 = arith.constant 0 : i32
    return %c0_i32, %c0_i32_0 : i32, i32
  }
  func.func @transform_2(%arg0: i32) -> (i32, i32, i32) {
    %c0_i32 = arith.constant 0 : i32
    %c0_i32_0 = arith.constant 0 : i32
    %c0_i32_1 = arith.constant 0 : i32
    return %arg0, %c0_i32, %c0_i32_0 : i32, i32, i32
  }
}

</mosaic_0001>

<bundles_post_ra>
// kernel: tpu_custom_call.1
= control target key start
LH: loop header
LB: loop body
LE: loop exit
PB: predicated region body
PF: predicated region fallthrough
CT: control target
= control target key end

     0   :  { %7 = vsyncpa [#allocation3], 0  ;;  %s218_s0 = inlined_call_operand.hbm [shape: f32[8,64], index: 0, kind: input, shape index: {}]   ;;  %s219_s1 = inlined_call_operand.hbm [shape: f32[32,32], index: 1, kind: input, shape index: {}]   ;;  %s220_s2 = inlined_call_operand.hbm [shape: f32[1,1,8], index: 2, kind: output, shape index: {}]  }
   0x1   :  { %8 = vsyncpa [#allocation6], 0 }
   0x2   :  { %9 = vsyncpa [#allocation4], 0  ;;  %s15_s11 = sshll.u32 %s218_s0, 4  ;;  %s188_s12 = smov [#allocation2]   ;;  %s16_s11 = int_to_ptr.hbm [resolvable:$true] %s15_s11 }
   0x3   :  { %s17_s13 = sshll.u32 %s188_s12, 4  ;;  %s25_s16 = sshll.u32 %s219_s1, 4  ;;  %s18_s13 = int_to_ptr.vmem [resolvable:$true] %s17_s13  ;;  %s26_s16 = int_to_ptr.hbm [resolvable:$true] %s25_s16 }
   0x4   :  { %20 = dma.hbm_to_vmem [thread:$0]  %s16_s11, 128, %s18_s13, [#allocation3]  }
   0x5   :  { %s189_s17 = smov [#allocation5]   ;;  %s190_s19 = smov 128  }
   0x6   :  { %s27_s18 = sshll.u32 %s189_s17, 4  ;;  %s191_s20 = smov 8   ;;  %s28_s18 = int_to_ptr.vmem [resolvable:$true] %s27_s18 }
   0x7   :  { %33 = dma.hbm_to_vmem [thread:$0]  %s26_s16, 512, %s28_s18, [#allocation6], %s190_s19, %s190_s19, %s191_s20  }
   0x8   :  { %182 = dma.done.wait [#allocation3], 128  }
   0x9   :  { %183 = vsyncadd [#allocation3], 4294967168 }
   0xa   :  { %184 = dma.done.wait [#allocation6], 512  }
   0xb   :  { %185 = vsyncadd [#allocation6], 4294966784  ;;  %v46_v0 = vld [vmem:[#allocation5 + $0x18] sm:$0xff]  ;;  %v45_v1 = vld [vmem:[#allocation5 + $0x10] sm:$0xff]  ;;  %s192_s0 = smov 96   ;;  %vm47_vm0 = vcmask 261120   ;;  %v79_v9 = vlaneseq }
   0xc   :  { %63 = vmatpush.msra.mxu0 %v46_v0  ;;  %v42_v2 = vld [vmem:[#allocation2] sm:$0xff]  ;;  %v44_v3 = vld [vmem:[#allocation5 + $0x8] sm:$0xff]  ;;  %v43_v4 = vld [vmem:[#allocation5] sm:$0xff]  ;;  %s193_s1 = smov [#allocation7]   ;;  %s92_s24 = sshll.u32 %s220_s2, 4  ;;  %vm83_vm1 = vcmask 57344   ;;  %s93_s24 = int_to_ptr.hbm [resolvable:$true] %s92_s24 }
   0xd   :  { %71 = vrot.lane.b32.xlu0 %v42_v2, %s192_s0  ;;  %v80_v10 = vand.u32 127, %v79_v9  ;;  %s90_s21 = sshll.u32 %s193_s1, 4  ;;  %s91_s21 = int_to_ptr.vmem [resolvable:$true] %s90_s21 }
   0xe   :  { %64 = vmatpush.msra.mxu0 %v45_v1 }
  0x10   :  { %65 = vmatpush.msra.mxu0 %v44_v3 }
  0x12   :  { %66 = vmatpush.msra.mxu0 %v43_v4 }
  0x13   :  { %103 = vmatmul.msk.f32.vlgmr.msra.gmra.mxu0 %vm47_vm0, %v42_v2 }
  0x7f   :  { %v72_v5 = vpop.permute.xlu0 %71 }
  0x90   :  { %v68_v6 = vpop.f32.mrf.mxu0 }
  0x91   :  { %v74_v7 = vmul.f32 %v72_v5, %v68_v6 }
  0x93   :  { %v75_v8 = vsel %vm47_vm0, %v74_v7, 0.0 }
  0x94   :  { %76 = vadd.xlane.f32.xlu0 %v75_v8 }
 0x107   :  { %v77_v11 = vpop.xlane.xlu0 %76 }
 0x108   :  { %v81_v12 = vperm.slane %v77_v11, %v80_v10 }
 0x10a   :  { %84 = vst.msk [vmem:[#allocation7] sm:$0x1] %vm83_vm1, %v81_v12 }
 0x10b   :  { %95 = dma.vmem_to_hbm [thread:$0]  %s91_s21, 16, %s93_s24, [#allocation4]  }
 0x10c   :  { %186 = dma.done.wait [#allocation4], 16  }
 0x10d   :  { %187 = vsyncadd [#allocation4], 4294967280 }
 0x10e   :  { %100 = vsyncpa [#allocation3], 1 }
 0x10f   :  { %101 = vsyncpa [#allocation6], 1 }
 0x110   :  { %102 = vsyncpa [#allocation4], 1 }

</bundles_post_ra>
